<compile_context>
chip_gen: v6e
topology: v6e:2x2x1
jax: 0.10.0
libtpu: 0.0.40
codegen_flags: <defaults>
</compile_context>

<pallas_src>
import functools

import jax
import jax.numpy as jnp
from jax import lax
from jax.experimental import pallas as pl
from jax.experimental.pallas import tpu as pltpu


def _ac_kernel(act_dim, obs_ref, w1_ref, b1_ref, w2_ref, b2_ref,
               wh_ref, bh_ref, out_ref):
    """One batch-tile of the shared-MLP actor-critic forward pass."""
    wdt = w1_ref.dtype                      # weight dtype (f32 or bf16)
    x = obs_ref[...]                        # [tile_b, obs_dim], already in weight dtype

    # shared features: Linear -> ReLU -> Linear -> ReLU  (out_activation='relu')
    h1 = jnp.dot(x, w1_ref[...], preferred_element_type=jnp.float32) + b1_ref[...]
    h1 = jnp.maximum(h1, 0.0)
    h2 = jnp.dot(h1.astype(wdt), w2_ref[...],
                 preferred_element_type=jnp.float32) + b2_ref[...]
    h2 = jnp.maximum(h2, 0.0)               # [tile_b, H] f32

    # fused policy + value heads: one lane-dense matmul -> [tile_b, head_pad]
    heads = jnp.dot(h2.astype(wdt), wh_ref[...],
                    preferred_element_type=jnp.float32) + bh_ref[...]

    # tanh only on the policy columns (col < act_dim); value column passes through.
    col = lax.broadcasted_iota(jnp.int32, heads.shape, dimension=1)
    out_ref[...] = jnp.where(col < act_dim, jnp.tanh(heads), heads).astype(out_ref.dtype)


def mlp_actor_critic_shared(obs, params, *, tile_b=512):
    """obs: [B, obs_dim] float32.  Returns (pi_mean [B, act_dim], value [B])."""
    B, obs_dim = obs.shape
    w1, b1, w2, b2, wh, bh = (params[k] for k in ("w1", "b1", "w2", "b2", "wh", "bh"))
    H = w1.shape[1]
    head_pad = wh.shape[1]                       # fused head width (multiple of 128)
    act_dim = params["log_var"].shape[0]
    wdt = w1.dtype
    out_dtype = jnp.bfloat16 if wdt == jnp.bfloat16 else jnp.float32

    # Pre-cast obs once in the wrapper (halves obs read stream for bf16 weights and
    # removes the per-tile VPU cast from the kernel).
    obs = obs.astype(wdt)

    # --- batch tiling -------------------------------------------------------
    sub = 16 if (jnp.dtype(wdt).itemsize < 4 or jnp.dtype(out_dtype).itemsize < 4) else 8
    tile_b = max(sub, pl.cdiv(tile_b, sub) * sub)
    tile_b = min(tile_b, pl.cdiv(B, sub) * sub)
    # Guarantee >= 2 grid steps whenever the batch allows it, so the 'parallel'
    # batch axis can shard across v7x's two TensorCores.
    if B > sub:
        tile_b = min(tile_b, max(sub, pl.cdiv(pl.cdiv(B, 2), sub) * sub))

    # --- VMEM budget (re-derived per call; v7x scoped default is 32 MiB of 64 MiB) ---
    in_item = jnp.dtype(wdt).itemsize
    out_item = jnp.dtype(out_dtype).itemsize
    w_bytes = sum(int(params[k].size) * jnp.dtype(params[k].dtype).itemsize
                  for k in ("w1", "b1", "w2", "b2", "wh", "bh"))

    def _tile_bytes(tb):
        return (2 * tb * obs_dim * in_item        # double-buffered obs tile
                + 2 * tb * head_pad * out_item    # double-buffered out tile
                + 2 * tb * H * 4)                 # h1/h2 f32 intermediates

    while tile_b > sub and w_bytes + _tile_bytes(tile_b) > (48 << 20):
        tile_b = max(sub, pl.cdiv(tile_b // 2, sub) * sub)
    vmem_limit = int(1.5 * (w_bytes + _tile_bytes(tile_b))) + (2 << 20)
    vmem_limit = min(max(vmem_limit, 32 << 20), 64 << 20)

    b_pad = pl.cdiv(B, tile_b) * tile_b
    obs_p = obs if b_pad == B else jnp.pad(obs, ((0, b_pad - B), (0, 0)))
    grid = (b_pad // tile_b,)

    row_spec = lambda shape: pl.BlockSpec(shape, lambda i: (i, 0))   # batch-tiled
    # Weights/biases: single whole-array copy resident in VMEM, DMA'd once
    # (no double-buffering of constant blocks).
    res_spec = pl.BlockSpec(memory_space=pltpu.MemorySpace.VMEM)

    # Advisory cost estimate so XLA schedules surrounding ops around the kernel.
    flops = 2 * b_pad * (obs_dim * H + H * H + H * head_pad)
    bytes_accessed = (b_pad * obs_dim * in_item + w_bytes + b_pad * head_pad * out_item)
    cost = pl.CostEstimate(flops=flops, transcendentals=b_pad * act_dim,
                           bytes_accessed=bytes_accessed)

    out = pl.pallas_call(
        functools.partial(_ac_kernel, act_dim),
        out_shape=jax.ShapeDtypeStruct((b_pad, head_pad), out_dtype),
        grid=grid,
        in_specs=[row_spec((tile_b, obs_dim)),
                  res_spec, res_spec,          # w1, b1
                  res_spec, res_spec,          # w2, b2
                  res_spec, res_spec],         # wh, bh (fused heads)
        out_specs=row_spec((tile_b, head_pad)),
        compiler_params=pltpu.CompilerParams(
            dimension_semantics=("parallel",),     # shard batch over v7x's 2 TCs
            vmem_limit_bytes=vmem_limit),
        cost_estimate=cost,
    )(obs_p, w1, b1, w2, b2, wh, bh)

    # One contiguous slice of the real columns, then split (single pass over the slab).
    head = out[:B, :act_dim + 1]
    pi_mean = head[:, :act_dim]                  # Tanh(policy_header(feature))
    value = head[:, act_dim].astype(jnp.float32)  # value_header + SqueezeLayer(dim=-1)
    return pi_mean, value


def init_params(key, obs_dim, mlp_hidden, act_dim):
    """Raw f32 linear params (weights stored [in, out], transposed vs torch)."""
    ks = jax.random.split(key, 8)

    def lin(kw, kb, fan_in, fan_out):
        bound = 1.0 / jnp.sqrt(fan_in)
        w = jax.random.uniform(kw, (fan_in, fan_out), jnp.float32, -bound, bound)
        b = jax.random.uniform(kb, (1, fan_out), jnp.float32, -bound, bound)
        return w, b

    w1, b1 = lin(ks[0], ks[1], obs_dim, mlp_hidden)
    w2, b2 = lin(ks[2], ks[3], mlp_hidden, mlp_hidden)
    wp, bp = lin(ks[4], ks[5], mlp_hidden, act_dim)
    wv, bv = lin(ks[6], ks[7], mlp_hidden, 1)

    # TODO(synk): IndependentNormalWithFixedVar / Categorical distribution objects have
    # no array-level Pallas equivalent; only the fixed log-variance parameter is carried.
    log_var = jnp.zeros((act_dim,), jnp.float32)

    return dict(w1=w1, b1=b1, w2=w2, b2=b2, wp=wp, bp=bp, wv=wv, bv=bv, log_var=log_var)


def prepare_params(raw, weight_dtype=jnp.bfloat16):
    """One-time param prep: cast weights, build fused lane-padded head (NOT per call)."""
    H = raw["w1"].shape[1]
    act_dim = raw["wp"].shape[1]
    head_pad = pl.cdiv(act_dim + 1, 128) * 128

    wh = jnp.zeros((H, head_pad), weight_dtype)
    wh = wh.at[:, :act_dim].set(raw["wp"].astype(weight_dtype))
    wh = wh.at[:, act_dim:act_dim + 1].set(raw["wv"].astype(weight_dtype))
    bh = jnp.zeros((1, head_pad), jnp.float32)
    bh = bh.at[:, :act_dim].set(raw["bp"].astype(jnp.float32))
    bh = bh.at[:, act_dim:act_dim + 1].set(raw["bv"].astype(jnp.float32))

    return dict(w1=raw["w1"].astype(weight_dtype), b1=raw["b1"].astype(jnp.float32),
                w2=raw["w2"].astype(weight_dtype), b2=raw["b2"].astype(jnp.float32),
                wh=wh, bh=bh, log_var=raw["log_var"])


def _reference(obs, p):
    """Pure-JAX f32 reference matching the PyTorch module."""
    h = jnp.maximum(obs @ p["w1"] + p["b1"], 0.0)
    h = jnp.maximum(h @ p["w2"] + p["b2"], 0.0)
    pi = jnp.tanh(h @ p["wp"] + p["bp"])
    v = jnp.squeeze(h @ p["wv"] + p["bv"], -1)
    return pi, v


if __name__ == "__main__":
    B, OBS_DIM, HIDDEN, ACT_DIM = 4, 16, 128, 6

    key = jax.random.PRNGKey(0)
    k_obs, k_par = jax.random.split(key)
    obs = jax.random.normal(k_obs, (B, OBS_DIM), jnp.float32)

    raw = init_params(k_par, OBS_DIM, HIDDEN, ACT_DIM)
    fwd = jax.jit(mlp_actor_critic_shared, static_argnames=("tile_b",))
    pi_ref, v_ref = _reference(obs, raw)

    # --- f32 weights: exact-path correctness check ---
    params_f32 = prepare_params(raw, jnp.float32)
    pi_mean, value = fwd(obs, params_f32)
    jax.block_until_ready((pi_mean, value))
    assert pi_mean.shape == (B, ACT_DIM) and value.shape == (B,)
    assert jnp.allclose(pi_mean, pi_ref, atol=1e-5)
    assert jnp.allclose(value, v_ref, atol=1e-5)

    # --- bf16 production path: bf16 weights + obs + output slab (f32 accumulation) ---
    params_bf16 = prepare_params(raw, jnp.bfloat16)
    pi_bf, v_bf = fwd(obs, params_bf16)
    jax.block_until_ready((pi_bf, v_bf))
    assert pi_bf.dtype == jnp.bfloat16
    assert jnp.allclose(pi_bf.astype(jnp.float32), pi_ref, atol=5e-2)
    assert jnp.allclose(v_bf, v_ref, atol=5e-2)

    # --- batched path: exercises >1 grid tile, batch padding and the 'parallel' axis ---
    B2 = 20
    obs2 = jax.random.normal(jax.random.PRNGKey(3), (B2, OBS_DIM), jnp.float32)
    pi2, v2 = fwd(obs2, params_f32, tile_b=8)     # b_pad=24 -> grid=(3,)
    jax.block_until_ready((pi2, v2))
    pi2_ref, v2_ref = _reference(obs2, raw)
    assert pi2.shape == (B2, ACT_DIM) and v2.shape == (B2,)
    assert jnp.allclose(pi2, pi2_ref, atol=1e-5)
    assert jnp.allclose(v2, v2_ref, atol=1e-5)

    print("KERNEL_OK")
</pallas_src>

<mosaic_0001>
module attributes {stable_mosaic.version = 11 : i64} {
  func.func @_ac_kernel(%arg0: i32, %arg1: memref<8x16xf32, #tpu.memory_space<vmem>>, %arg2: memref<16x128xf32, #tpu.memory_space<vmem>>, %arg3: memref<1x128xf32, #tpu.memory_space<vmem>>, %arg4: memref<128x128xf32, #tpu.memory_space<vmem>>, %arg5: memref<1x128xf32, #tpu.memory_space<vmem>>, %arg6: memref<128x128xf32, #tpu.memory_space<vmem>>, %arg7: memref<1x128xf32, #tpu.memory_space<vmem>>, %arg8: memref<8x128xf32, #tpu.memory_space<vmem>>) attributes {dimension_semantics = [#tpu.dimension_semantics<parallel>], iteration_bounds = array<i64: 1>, scalar_prefetch = 0 : i64, scratch_operands = 0 : i64, tpu.core_type = #tpu.core_type<tc>, window_params = [{transform_indices = @transform_0, window_bounds = array<i64: 8, 16>}, {pipeline_mode = #tpu.pipeline_mode<synchronous>, transform_indices = @transform_1, window_bounds = array<i64: 16, 128>}, {pipeline_mode = #tpu.pipeline_mode<synchronous>, transform_indices = @transform_2, window_bounds = array<i64: 1, 128>}, {pipeline_mode = #tpu.pipeline_mode<synchronous>, transform_indices = @transform_3, window_bounds = array<i64: 128, 128>}, {pipeline_mode = #tpu.pipeline_mode<synchronous>, transform_indices = @transform_4, window_bounds = array<i64: 1, 128>}, {pipeline_mode = #tpu.pipeline_mode<synchronous>, transform_indices = @transform_5, window_bounds = array<i64: 128, 128>}, {pipeline_mode = #tpu.pipeline_mode<synchronous>, transform_indices = @transform_6, window_bounds = array<i64: 1, 128>}, {transform_indices = @transform_7, window_bounds = array<i64: 8, 128>}]} {
    %c0 = arith.constant 0 : index
    %c0_0 = arith.constant 0 : index
    %0 = vector.load %arg1[%c0, %c0_0] : memref<8x16xf32, #tpu.memory_space<vmem>>, vector<8x16xf32>
    %c0_1 = arith.constant 0 : index
    %c0_2 = arith.constant 0 : index
    %1 = vector.load %arg2[%c0_1, %c0_2] : memref<16x128xf32, #tpu.memory_space<vmem>>, vector<16x128xf32>
    %cst = arith.constant dense<0.000000e+00> : vector<8x128xf32>
    %2 = tpu.matmul %0, %1, %cst {dimension_numbers = #tpu.dot_dimension_numbers<[1], [0], [0], [1], [0, 0, 1, 1], [], []>} : vector<8x16xf32>, vector<16x128xf32>, vector<8x128xf32> -> vector<8x128xf32>
    %c0_3 = arith.constant 0 : index
    %c0_4 = arith.constant 0 : index
    %3 = vector.load %arg3[%c0_3, %c0_4] : memref<1x128xf32, #tpu.memory_space<vmem>>, vector<1x128xf32>
    %4 = vector.broadcast %3 : vector<1x128xf32> to vector<8x128xf32>
    %5 = arith.addf %2, %4 : vector<8x128xf32>
    %cst_5 = arith.constant 0.000000e+00 : f32
    %6 = vector.broadcast %cst_5 : f32 to vector<8x128xf32>
    %7 = arith.maximumf %5, %6 : vector<8x128xf32>
    %c0_6 = arith.constant 0 : index
    %c0_7 = arith.constant 0 : index
    %8 = vector.load %arg4[%c0_6, %c0_7] : memref<128x128xf32, #tpu.memory_space<vmem>>, vector<128x128xf32>
    %cst_8 = arith.constant dense<0.000000e+00> : vector<8x128xf32>
    %9 = tpu.matmul %7, %8, %cst_8 {dimension_numbers = #tpu.dot_dimension_numbers<[1], [0], [0], [1], [0, 0, 1, 1], [], []>} : vector<8x128xf32>, vector<128x128xf32>, vector<8x128xf32> -> vector<8x128xf32>
    %c0_9 = arith.constant 0 : index
    %c0_10 = arith.constant 0 : index
    %10 = vector.load %arg5[%c0_9, %c0_10] : memref<1x128xf32, #tpu.memory_space<vmem>>, vector<1x128xf32>
    %11 = vector.broadcast %10 : vector<1x128xf32> to vector<8x128xf32>
    %12 = arith.addf %9, %11 : vector<8x128xf32>
    %cst_11 = arith.constant 0.000000e+00 : f32
    %13 = vector.broadcast %cst_11 : f32 to vector<8x128xf32>
    %14 = arith.maximumf %12, %13 : vector<8x128xf32>
    %c0_12 = arith.constant 0 : index
    %c0_13 = arith.constant 0 : index
    %15 = vector.load %arg6[%c0_12, %c0_13] : memref<128x128xf32, #tpu.memory_space<vmem>>, vector<128x128xf32>
    %cst_14 = arith.constant dense<0.000000e+00> : vector<8x128xf32>
    %16 = tpu.matmul %14, %15, %cst_14 {dimension_numbers = #tpu.dot_dimension_numbers<[1], [0], [0], [1], [0, 0, 1, 1], [], []>} : vector<8x128xf32>, vector<128x128xf32>, vector<8x128xf32> -> vector<8x128xf32>
    %c0_15 = arith.constant 0 : index
    %c0_16 = arith.constant 0 : index
    %17 = vector.load %arg7[%c0_15, %c0_16] : memref<1x128xf32, #tpu.memory_space<vmem>>, vector<1x128xf32>
    %18 = vector.broadcast %17 : vector<1x128xf32> to vector<8x128xf32>
    %19 = arith.addf %16, %18 : vector<8x128xf32>
    %20 = tpu.iota {dimensions = array<i32: 1>} : vector<8x128xi32>
    %c6_i32 = arith.constant 6 : i32
    %21 = vector.broadcast %c6_i32 : i32 to vector<8x128xi32>
    %22 = arith.cmpi slt, %20, %21 : vector<8x128xi32>
    %23 = math.tanh %19 : vector<8x128xf32>
    %24 = arith.select %22, %23, %19 : vector<8x128xi1>, vector<8x128xf32>
    %c0_17 = arith.constant 0 : index
    %c0_18 = arith.constant 0 : index
    %25 = vector.load %arg8[%c0_17, %c0_18] : memref<8x128xf32, #tpu.memory_space<vmem>>, vector<8x128xf32>
    tpu.vector_store %arg8[%c0_17, %c0_18], %24 {strides = array<i32>} : memref<8x128xf32, #tpu.memory_space<vmem>>, vector<8x128xf32>,
    return
  }
  func.func @transform_0(%arg0: i32) -> (i32, i32) {
    %c0_i32 = arith.constant 0 : i32
    %c0_i32_0 = arith.constant 0 : i32
    return %arg0, %c0_i32 : i32, i32
  }
  func.func @transform_1(%arg0: i32) -> (i32, i32) {
    %c0_i32 = arith.constant 0 : i32
    %c0_i32_0 = arith.constant 0 : i32
    %c0_i32_1 = arith.constant 0 : i32
    return %c0_i32, %c0_i32_0 : i32, i32
  }
  func.func @transform_2(%arg0: i32) -> (i32, i32) {
    %c0_i32 = arith.constant 0 : i32
    %c0_i32_0 = arith.constant 0 : i32
    %c0_i32_1 = arith.constant 0 : i32
    return %c0_i32, %c0_i32_0 : i32, i32
  }
  func.func @transform_3(%arg0: i32) -> (i32, i32) {
    %c0_i32 = arith.constant 0 : i32
    %c0_i32_0 = arith.constant 0 : i32
    %c0_i32_1 = arith.constant 0 : i32
    return %c0_i32, %c0_i32_0 : i32, i32
  }
  func.func @transform_4(%arg0: i32) -> (i32, i32) {
    %c0_i32 = arith.constant 0 : i32
    %c0_i32_0 = arith.constant 0 : i32
    %c0_i32_1 = arith.constant 0 : i32
    return %c0_i32, %c0_i32_0 : i32, i32
  }
  func.func @transform_5(%arg0: i32) -> (i32, i32) {
    %c0_i32 = arith.constant 0 : i32
    %c0_i32_0 = arith.constant 0 : i32
    %c0_i32_1 = arith.constant 0 : i32
    return %c0_i32, %c0_i32_0 : i32, i32
  }
  func.func @transform_6(%arg0: i32) -> (i32, i32) {
    %c0_i32 = arith.constant 0 : i32
    %c0_i32_0 = arith.constant 0 : i32
    %c0_i32_1 = arith.constant 0 : i32
    return %c0_i32, %c0_i32_0 : i32, i32
  }
  func.func @transform_7(%arg0: i32) -> (i32, i32) {
    %c0_i32 = arith.constant 0 : i32
    %c0_i32_0 = arith.constant 0 : i32
    return %arg0, %c0_i32 : i32, i32
  }
}

</mosaic_0001>

<bundles_post_ra>
// kernel: mlp_actor_critic_shared.1
= control target key start
LH: loop header
LB: loop body
LE: loop exit
PB: predicated region body
PF: predicated region fallthrough
CT: control target
= control target key end

     0   :  { %12 = vsyncpa [#allocation3], 0  ;;  %s621_s0 = inlined_call_operand.vmem [shape: f32[8,16], index: 0, kind: input, shape index: {}]   ;;  %s622_s1 = inlined_call_operand.vmem [shape: f32[16,128], index: 1, kind: input, shape index: {}]   ;;  %s623_s2 = inlined_call_operand.vmem [shape: f32[1,128], index: 2, kind: input, shape index: {}]   ;;  %s624_s3 = inlined_call_operand.hbm [shape: f32[128,128], index: 3, kind: input, shape index: {}]   ;;  %s625_s4 = inlined_call_operand.vmem [shape: f32[1,128], index: 4, kind: input, shape index: {}]   ;;  %s626_s5 = inlined_call_operand.hbm [shape: f32[128,128], index: 5, kind: input, shape index: {}]   ;;  %s627_s6 = inlined_call_operand.vmem [shape: f32[1,128], index: 6, kind: input, shape index: {}]   ;;  %s628_s7 = inlined_call_operand.vmem [shape: f32[8,128], index: 7, kind: output, shape index: {}]  }
   0x1   :  { %13 = vsyncpa [#allocation5], 0  ;;  %s508_s24 = smov [#allocation2]  }
   0x2   :  { %s25_s25 = sshll.u32 %s508_s24, 4  ;;  %s26_s25 = int_to_ptr.vmem [resolvable:$true] %s25_s25 }
   0x3   :  { %s472_s26 = scalar_lea.vmem %s26_s25, 2048  ;;  %p477_p1 = scmp.lt.s32.totalorder %s26_s25, %s26_s25 }
   0x4   :  { %p473_p0 = scmp.ne.s32.totalorder %s26_s25, %s472_s26  ;;  %p478_p2 = scmp.lt.s32.totalorder %s472_s26, %s472_s26 }
   0x6   :  { %p479_p3 = por %p478_p2, %p477_p1 }
   0x8   :  { %p480_p4 = pnand %p479_p3, %p473_p0 }
   0xa   :  { %483 = shalt.err (!%p480_p4)
}
   0xb   :  { %s509_s27 = smov 128   ;;  %s510_s28 = smov 8  }
   0xc   :  { %31 = dma.hbm_to_vmem [thread:$0]  %s624_s3, 2048, %s26_s25, [#allocation3], %s509_s27, %s509_s27, %s510_s28  }
   0xd   :  { %s511_s8 = smov [#allocation4]  }
   0xe   :  { %s39_s9 = sshll.u32 %s511_s8, 4  ;;  %s40_s9 = int_to_ptr.vmem [resolvable:$true] %s39_s9 }
   0xf   :  { %s492_s10 = scalar_lea.vmem %s40_s9, 2048  ;;  %p497_p6 = scmp.lt.s32.totalorder %s40_s9, %s40_s9 }
  0x10   :  { %p493_p5 = scmp.ne.s32.totalorder %s40_s9, %s492_s10  ;;  %p498_p7 = scmp.lt.s32.totalorder %s492_s10, %s492_s10 }
  0x12   :  { %p499_p8 = por %p498_p7, %p497_p6 }
  0x14   :  { %p500_p9 = pnand %p499_p8, %p493_p5 }
  0x16   :  { %503 = shalt.err (!%p500_p9)
}
  0x17   :  { %45 = dma.hbm_to_vmem [thread:$0]  %s626_s5, 2048, %s40_s9, [#allocation5], %s509_s27, %s509_s27, %s510_s28  }
  0x18   :  { %504 = dma.done.wait [#allocation3], 2048  }
  0x19   :  { %505 = vsyncadd [#allocation3], 4294965248 }
  0x1a   :  { %506 = dma.done.wait [#allocation5], 2048  }
  0x1b   :  { %507 = vsyncadd [#allocation5], 4294965248  ;;  %v512_v0 = vmov 0.0   ;;  %vm513_vm0 = vmmov 0   ;;  %v56_v1 = vld [vmem:[%s622_s1 + $0x8] sm:$0xff]  ;;  %v55_v2 = vld [vmem:[%s622_s1] sm:$0xff]  ;;  %v326_v50 = vlaneseq }
  0x1c   :  { %379 = vmatprep.subr.mxu0 %v512_v0  ;;  %383 = vmatprep.mubr.msk.f32.mxu0 %vm513_vm0, %v512_v0  ;;  %v54_v3 = vld [vmem:[%s621_s0] sm:$0xff]  ;;  %vm64_vm1 = vcmask 130048   ;;  %v154_v4 = vld [vmem:[#allocation2 + $0x78] sm:$0xff]  ;;  %v153_v5 = vld [vmem:[#allocation2 + $0x70] sm:$0xff] }
  0x1d   :  { %386 = vmatprep.subr.mxu1 %v512_v0  ;;  %418 = vmatprep.mubr.msk.f32.mxu1 %vm513_vm0, %v512_v0  ;;  %v152_v6 = vld [vmem:[#allocation2 + $0x68] sm:$0xff]  ;;  %v151_v7 = vld [vmem:[#allocation2 + $0x60] sm:$0xff]  ;;  %v150_v8 = vld [vmem:[#allocation2 + $0x58] sm:$0xff]  ;;  %v327_v51 = vand.u32 127, %v326_v50 }
  0x1e   :  { %380 = vmatpush3.msra.mxu0 %v56_v1  ;;  %387 = vmatpush3.msra.mxu1 %v154_v4  ;;  %v149_v9 = vld [vmem:[#allocation2 + $0x50] sm:$0xff]  ;;  %v148_v10 = vld [vmem:[#allocation2 + $0x48] sm:$0xff]  ;;  %v147_v11 = vld [vmem:[#allocation2 + $0x40] sm:$0xff] }
  0x1f   :  { %381 = vmatprep.subr.mxu0 %v512_v0  ;;  %388 = vmatprep.subr.mxu1 %v512_v0  ;;  %v146_v12 = vld [vmem:[#allocation2 + $0x38] sm:$0xff]  ;;  %v145_v13 = vld [vmem:[#allocation2 + $0x30] sm:$0xff]  ;;  %v144_v14 = vld [vmem:[#allocation2 + $0x28] sm:$0xff]  ;;  %vm328_vm2 = vcmp.lt.s32.totalorder %v327_v51, 6 }
  0x20   :  { %382 = vmatpush3.msra.mxu0 %v55_v2  ;;  %389 = vmatpush3.msra.mxu1 %v153_v5  ;;  %v143_v15 = vld [vmem:[#allocation2 + $0x20] sm:$0xff]  ;;  %v142_v16 = vld [vmem:[#allocation2 + $0x18] sm:$0xff]  ;;  %v141_v17 = vld [vmem:[#allocation2 + $0x10] sm:$0xff] }
  0x21   :  { %384 = vmatmul.mubr.msk.f32.vlgmr.msra.gmra.mxu0 %vm64_vm1, %v54_v3  ;;  %390 = vmatprep.subr.mxu1 %v512_v0  ;;  %v140_v18 = vld [vmem:[#allocation2 + $0x8] sm:$0xff]  ;;  %v139_v19 = vld [vmem:[#allocation2] sm:$0xff]  ;;  %v248_v20 = vld [vmem:[#allocation4 + $0x78] sm:$0xff] }
  0x22   :  { %421 = vmatprep.subr.mxu0 %v512_v0  ;;  %391 = vmatpush3.msra.mxu1 %v152_v6  ;;  %v247_v21 = vld [vmem:[#allocation4 + $0x70] sm:$0xff]  ;;  %v246_v22 = vld [vmem:[#allocation4 + $0x68] sm:$0xff]  ;;  %v245_v23 = vld [vmem:[#allocation4 + $0x60] sm:$0xff] }
  0x23   :  { %453 = vmatprep.mubr.msk.f32.mxu0 %vm513_vm0, %v512_v0  ;;  %392 = vmatprep.subr.mxu1 %v512_v0  ;;  %v244_v24 = vld [vmem:[#allocation4 + $0x58] sm:$0xff]  ;;  %v243_v25 = vld [vmem:[#allocation4 + $0x50] sm:$0xff]  ;;  %v242_v26 = vld [vmem:[#allocation4 + $0x48] sm:$0xff] }
  0x24   :  { %393 = vmatpush3.msra.mxu1 %v151_v7  ;;  %422 = vmatpush3.msra.mxu0 %v248_v20  ;;  %v241_v27 = vld [vmem:[#allocation4 + $0x40] sm:$0xff]  ;;  %v240_v28 = vld [vmem:[#allocation4 + $0x38] sm:$0xff]  ;;  %v239_v29 = vld [vmem:[#allocation4 + $0x30] sm:$0xff] }
  0x25   :  { %394 = vmatprep.subr.mxu1 %v512_v0  ;;  %423 = vmatprep.subr.mxu0 %v512_v0  ;;  %v238_v30 = vld [vmem:[#allocation4 + $0x28] sm:$0xff]  ;;  %v237_v31 = vld [vmem:[#allocation4 + $0x20] sm:$0xff]  ;;  %v236_v32 = vld [vmem:[#allocation4 + $0x18] sm:$0xff] }
  0x26   :  { %395 = vmatpush3.msra.mxu1 %v150_v8  ;;  %424 = vmatpush3.msra.mxu0 %v247_v21  ;;  %v338_v33 = vld [vmem:[%s623_s2] ss:$0 sm:$0xff]  ;;  %v235_v38 = vld [vmem:[#allocation4 + $0x10] sm:$0xff]  ;;  %v234_v39 = vld [vmem:[#allocation4 + $0x8] sm:$0xff] }
  0x27   :  { %396 = vmatprep.subr.mxu1 %v512_v0  ;;  %425 = vmatprep.subr.mxu0 %v512_v0  ;;  %v233_v40 = vld [vmem:[#allocation4] sm:$0xff] }
  0x28   :  { %397 = vmatpush3.msra.mxu1 %v149_v9  ;;  %426 = vmatpush3.msra.mxu0 %v246_v22  ;;  %v340_v41 = vld [vmem:[%s625_s4] ss:$0 sm:$0xff] }
  0x29   :  { %398 = vmatprep.subr.mxu1 %v512_v0  ;;  %427 = vmatprep.subr.mxu0 %v512_v0  ;;  %v341_v46 = vld [vmem:[%s627_s6] ss:$0 sm:$0xff] }
  0x2a   :  { %399 = vmatpush3.msra.mxu1 %v148_v10  ;;  %428 = vmatpush3.msra.mxu0 %v245_v23 }
  0x2b   :  { %400 = vmatprep.subr.mxu1 %v512_v0  ;;  %429 = vmatprep.subr.mxu0 %v512_v0 }
  0x2c   :  { %401 = vmatpush3.msra.mxu1 %v147_v11  ;;  %430 = vmatpush3.msra.mxu0 %v244_v24 }
  0x2d   :  { %402 = vmatprep.subr.mxu1 %v512_v0  ;;  %431 = vmatprep.subr.mxu0 %v512_v0 }
  0x2e   :  { %403 = vmatpush3.msra.mxu1 %v146_v12  ;;  %432 = vmatpush3.msra.mxu0 %v243_v25 }
  0x2f   :  { %404 = vmatprep.subr.mxu1 %v512_v0  ;;  %433 = vmatprep.subr.mxu0 %v512_v0 }
  0x30   :  { %405 = vmatpush3.msra.mxu1 %v145_v13  ;;  %434 = vmatpush3.msra.mxu0 %v242_v26 }
  0x31   :  { %406 = vmatprep.subr.mxu1 %v512_v0  ;;  %435 = vmatprep.subr.mxu0 %v512_v0 }
  0x32   :  { %407 = vmatpush3.msra.mxu1 %v144_v14  ;;  %436 = vmatpush3.msra.mxu0 %v241_v27 }
  0x33   :  { %408 = vmatprep.subr.mxu1 %v512_v0  ;;  %437 = vmatprep.subr.mxu0 %v512_v0 }
  0x34   :  { %409 = vmatpush3.msra.mxu1 %v143_v15  ;;  %438 = vmatpush3.msra.mxu0 %v240_v28 }
  0x35   :  { %410 = vmatprep.subr.mxu1 %v512_v0  ;;  %439 = vmatprep.subr.mxu0 %v512_v0 }
  0x36   :  { %411 = vmatpush3.msra.mxu1 %v142_v16  ;;  %440 = vmatpush3.msra.mxu0 %v239_v29 }
  0x37   :  { %412 = vmatprep.subr.mxu1 %v512_v0  ;;  %441 = vmatprep.subr.mxu0 %v512_v0 }
  0x38   :  { %413 = vmatpush3.msra.mxu1 %v141_v17  ;;  %442 = vmatpush3.msra.mxu0 %v238_v30 }
  0x39   :  { %414 = vmatprep.subr.mxu1 %v512_v0  ;;  %443 = vmatprep.subr.mxu0 %v512_v0 }
  0x3a   :  { %415 = vmatpush3.msra.mxu1 %v140_v18  ;;  %444 = vmatpush3.msra.mxu0 %v237_v31 }
  0x3b   :  { %416 = vmatprep.subr.mxu1 %v512_v0  ;;  %445 = vmatprep.subr.mxu0 %v512_v0 }
  0x3c   :  { %417 = vmatpush3.msra.mxu1 %v139_v19  ;;  %446 = vmatpush3.msra.mxu0 %v236_v32 }
  0x3d   :  { %447 = vmatprep.subr.mxu0 %v512_v0 }
  0x3e   :  { %448 = vmatpush3.msra.mxu0 %v235_v38 }
  0x3f   :  { %449 = vmatprep.subr.mxu0 %v512_v0 }
  0x40   :  { %450 = vmatpush3.msra.mxu0 %v234_v39 }
  0x41   :  { %451 = vmatprep.subr.mxu0 %v512_v0 }
  0x42   :  { %452 = vmatpush3.msra.mxu0 %v233_v40 }
  0xe1   :  { %v134_v34 = vpop.f32.mrf.mxu0 }
  0xe2   :  { %v135_v35 = vadd.f32 %v338_v33, %v134_v34 }
  0xe3   :  { %v385_v36 = vpop.f32.mrf.mxu0 }
  0xe4   :  { %v138_v37 = vmax.f32 %v135_v35, 0.0 }
  0xe6   :  { %419 = vmatmul.mubr.f32.vlgmr.msra.gmra.mxu1 %v138_v37 }
 0x1a6   :  { %v228_v42 = vpop.f32.mrf.mxu1 }
 0x1a7   :  { %v229_v43 = vadd.f32 %v340_v41, %v228_v42 }
 0x1a8   :  { %v420_v44 = vpop.f32.mrf.mxu1 }
 0x1a9   :  { %v232_v45 = vmax.f32 %v229_v43, 0.0 }
 0x1ab   :  { %454 = vmatmul.mubr.f32.vlgmr.msra.gmra.mxu0 %v232_v45 }
 0x26b   :  { %v322_v47 = vpop.f32.mrf.mxu0 }
 0x26c   :  { %v323_v48 = vadd.f32 %v341_v46, %v322_v47 }
 0x26d   :  { %v455_v49 = vpop.f32.mrf.mxu0 }
 0x26e   :  { %462 = vtanh.f32 %v323_v48 }
 0x27b   :  { %v463_v52 = vpop.eup %462 }
 0x27c   :  { %v330_v53 = vsel %vm328_vm2, %v463_v52, %v323_v48 }
 0x27d   :  { %331 = vst [vmem:[%s628_s7] sm:$0xff] %v330_v53 }
 0x27e   :  { %336 = vsyncpa [#allocation3], 1 }
 0x27f   :  { %337 = vsyncpa [#allocation5], 1 }

</bundles_post_ra>
